<compile_context>
chip_gen: v5e
topology: v5e:2x2
jax: 0.10.0
libtpu: 0.0.40
codegen_flags: <defaults>
</compile_context>

<pallas_src>
import functools

import jax
import jax.numpy as jnp
from jax.experimental import pallas as pl
from jax.experimental.pallas import tpu as pltpu


def _round_up(v, m):
    return (v + m - 1) // m * m


def _vmem_capacity_bytes():
    """Physical VMEM of the local TPU; conservative 64 MiB (v7x) fallback."""
    try:
        return int(pltpu.get_tpu_info().vmem_capacity_bytes)
    except Exception:
        return 64 * 1024 * 1024


def _choose_node_tile(n, target):
    """Pick (tile, padded_n): lane-dense tile (multiple of 128) + padded node count."""
    n128 = _round_up(n, 128)
    if n128 <= target:
        return n128, n128
    t = (target // 128) * 128
    while t >= 256:
        if n128 % t == 0:
            return t, n128
        t -= 128
    # No decent divisor: pad N up to a multiple of `target`; a few % extra flops
    # beats 128-wide tiles (~29% vs ~85% of HBM roofline).
    return target, _round_up(n, target)


def _plan(m_rows, n, cap, *, sub, esize):
    """Tiling plan for the (m_rows, n) @ (n, n) node-mix matmul."""
    budget = max(cap - (16 << 20), 16 << 20)          # headroom below physical VMEM
    target = 1024 if cap >= (100 << 20) else 512      # fat tiles on 128-MiB parts
    tile, n_p = _choose_node_tile(n, target)

    m_g = _round_up(m_rows, sub)
    dad_bytes = 2 * esize * tile * tile               # double-buffered DAD^T tile
    per_row = 2 * esize * tile + 2 * 4 * tile         # dbl-buf act row + f32 out row
    tm_cap = max(sub, ((budget - dad_bytes) // per_row) // sub * sub)
    if m_g <= tm_cap:
        tm, m_p = m_g, m_g
    else:                                             # row-tile only when VMEM demands it
        tm = min(tm_cap, 2048)
        m_p = _round_up(m_g, tm)

    # Keep the activation block resident over the node axis when it fits:
    # it is then fetched from HBM once instead of once per output-node tile.
    act_resident = (n_p > tile) and (
        2 * esize * tm * n_p + dad_bytes + 2 * 4 * tm * tile <= budget)
    return tile, n_p, tm, m_p, act_resident


def _node_mix_kernel(act_ref, dad_ref, o_ref, *, tk, act_resident):
    """One (TM, TK) @ (TK, TN) step, accumulated into the resident f32 output block."""
    k = pl.program_id(2)

    @pl.when(k == 0)
    def _init():
        o_ref[...] = jnp.zeros_like(o_ref)

    if act_resident:
        start = pl.multiple_of(k * tk, tk)            # act block is (TM, n_p): slice k-tile
        a = act_ref[:, pl.ds(start, tk)]
    else:
        a = act_ref[...]
    o_ref[...] += jnp.dot(a, dad_ref[...], preferred_element_type=jnp.float32)


def _node_mix(act, dad_t, *, use_bf16=False):
    """Per-batch act_b @ dad_t for act (B, C, N), dad_t (N, N). Returns (B, C, N) f32."""
    B, C, N = act.shape
    in_dtype = jnp.bfloat16 if use_bf16 else jnp.float32
    sub = 16 if use_bf16 else 8
    esize = jnp.dtype(in_dtype).itemsize
    cap = _vmem_capacity_bytes()

    M = B * C
    tile, n_p, tm, m_p, act_res = _plan(M, N, cap, sub=sub, esize=esize)

    # Pad to TPU-friendly granules (zero rows/cols contribute nothing).
    af = jnp.zeros((B, C, n_p), in_dtype).at[:, :, :N].set(act.astype(in_dtype))
    af = af.reshape(M, n_p)
    if m_p != M:
        af = jnp.pad(af, ((0, m_p - M), (0, 0)))
    dt = jnp.zeros((n_p, n_p), in_dtype).at[:N, :N].set(dad_t.astype(in_dtype))

    grid = (m_p // tm, n_p // tile, n_p // tile)      # (row tile, node tile, contraction)
    if act_res:
        act_spec = pl.BlockSpec((tm, n_p), lambda i, j, k: (i, 0))
    else:
        act_spec = pl.BlockSpec((tm, tile), lambda i, j, k: (i, k))
    dad_spec = pl.BlockSpec((tile, tile), lambda i, j, k: (k, j))
    out_spec = pl.BlockSpec((tm, tile), lambda i, j, k: (i, j))

    need = (2 * esize * tm * (n_p if act_res else tile)
            + 2 * esize * tile * tile
            + 2 * 4 * tm * tile)
    vmem_limit = int(min(cap - (8 << 20), max(need + (4 << 20), 32 << 20)))

    cost = pl.CostEstimate(
        flops=2 * m_p * n_p * n_p,
        transcendentals=0,
        bytes_accessed=int(esize * ((1 if act_res else grid[1]) * m_p * n_p   # act reads
                                    + grid[0] * n_p * n_p)                    # DAD^T reads
                           + 4 * m_p * n_p),                                  # out writes
    )

    out = pl.pallas_call(
        functools.partial(_node_mix_kernel, tk=tile, act_resident=act_res),
        out_shape=jax.ShapeDtypeStruct((m_p, n_p), jnp.float32),
        grid=grid,
        in_specs=[act_spec, dad_spec],
        out_specs=out_spec,
        compiler_params=pltpu.CompilerParams(
            dimension_semantics=("parallel", "parallel", "arbitrary"),
            vmem_limit_bytes=vmem_limit,
        ),
        cost_estimate=cost,
    )(af, dt)

    return out[:M].reshape(B, C, n_p)[:, :, :N]


def gcn_layer_renorm(dad_tild, w, x, *, use_bf16=False):
    """GCNLayerRenorm 3-D forward (bias=False): x (B, C_in, N) -> (B, C_out, N)."""
    B, C_in, N = x.shape
    C_out = w.shape[1]
    assert dad_tild.shape == (N, N) and w.shape[0] == C_in

    f32 = jnp.float32
    x = x.astype(f32)
    w = w.astype(f32)
    dad_t = jnp.transpose(dad_tild.astype(f32))       # DAD^T (no symmetry assumed)
    hp = jax.lax.Precision.HIGHEST

    # Apply W before the big N x N contraction iff it does not grow its row count
    # (C_out <= C_in) or the row count stays within one MXU granule anyway.
    if C_out <= C_in or B * _round_up(C_out, 8) <= 256:
        y = jnp.einsum('co,bcn->bon', w, x, precision=hp)      # W^T @ X_b   (tiny, XLA)
        return _node_mix(y, dad_t, use_bf16=use_bf16)          # Y_b @ DAD^T (Pallas)
    h = _node_mix(x, dad_t, use_bf16=use_bf16)                 # X_b @ DAD^T (Pallas)
    return jnp.einsum('co,bcn->bon', w, h, precision=hp)       # W^T @ H_b   (tiny, XLA)


if __name__ == "__main__":
    key = jax.random.PRNGKey(0)
    k_adj, k_w, k_x = jax.random.split(key, 3)

    def make_dad(k, n):
        # Renormalized adjacency: DAD_tild = D^{-1/2} (A + I) D^{-1/2}
        a = (jax.random.uniform(k, (n, n)) > 0.7).astype(jnp.float32)
        a = jnp.maximum(a, a.T)
        a_tild = a + jnp.eye(n, dtype=jnp.float32)
        d_inv_sqrt = 1.0 / jnp.sqrt(a_tild.sum(axis=1))
        return d_inv_sqrt[:, None] * a_tild * d_inv_sqrt[None, :]

    def reference(dad, w, x):
        # Pure-JAX version of the PyTorch 3-D forward.
        xt = jnp.transpose(x, (0, 2, 1))
        r = jnp.einsum('ij,bjm,ml->bil', dad, xt, w,
                       precision=jax.lax.Precision.HIGHEST)
        return jnp.transpose(r, (0, 2, 1))

    fwd = jax.jit(gcn_layer_renorm)

    # --- primary small test (module-consistent shapes) -----------------------
    B, N, c_in, c_out = 2, 16, 8, 32
    dad = make_dad(k_adj, N)
    W = 0.1 * jax.random.normal(k_w, (c_in, c_out), dtype=jnp.float32)
    x = jax.random.normal(k_x, (B, c_in, N), dtype=jnp.float32)

    out = jax.block_until_ready(fwd(dad, W, x))
    ref = reference(dad, W, x)
    assert out.shape == (B, c_out, N)
    assert jnp.allclose(out, ref, atol=1e-5, rtol=1e-5), \
        float(jnp.max(jnp.abs(out - ref)))

    # --- secondary test: multi-tile node axis + W applied after the kernel ---
    B2, N2, c_in2, c_out2 = 2, 700, 40, 200
    k_adj2, k_w2, k_x2 = jax.random.split(jax.random.PRNGKey(0), 3)
    dad2 = make_dad(k_adj2, N2)
    W2 = 0.1 * jax.random.normal(k_w2, (c_in2, c_out2), dtype=jnp.float32)
    x2 = jax.random.normal(k_x2, (B2, c_in2, N2), dtype=jnp.float32)

    out2 = jax.block_until_ready(fwd(dad2, W2, x2))
    ref2 = reference(dad2, W2, x2)
    assert out2.shape == (B2, c_out2, N2)
    assert jnp.allclose(out2, ref2, atol=5e-5, rtol=5e-5), \
        float(jnp.max(jnp.abs(out2 - ref2)))

    print("KERNEL_OK")
</pallas_src>

<mosaic_0001>
module attributes {stable_mosaic.version = 11 : i64} {
  func.func @_node_mix_kernel(%arg0: i32, %arg1: i32, %arg2: i32, %arg3: memref<64x128xf32, #tpu.memory_space<vmem>>, %arg4: memref<128x128xf32, #tpu.memory_space<vmem>>, %arg5: memref<64x128xf32, #tpu.memory_space<vmem>>) attributes {dimension_semantics = [#tpu.dimension_semantics<parallel>, #tpu.dimension_semantics<parallel>, #tpu.dimension_semantics<arbitrary>], iteration_bounds = array<i64: 1, 1, 1>, scalar_prefetch = 0 : i64, scratch_operands = 0 : i64, tpu.core_type = #tpu.core_type<tc>, window_params = [{transform_indices = @transform_0, window_bounds = array<i64: 64, 128>}, {transform_indices = @transform_1, window_bounds = array<i64: 128, 128>}, {transform_indices = @transform_2, window_bounds = array<i64: 64, 128>}]} {
    %c0_i32 = arith.constant 0 : i32
    %0 = arith.cmpi eq, %arg2, %c0_i32 : i32
    %1 = arith.extui %0 : i1 to i32
    %c0_i32_0 = arith.constant 0 : i32
    %2 = arith.cmpi ne, %1, %c0_i32_0 : i32
    scf.if %2 {
      %cst_8 = arith.constant 0.000000e+00 : f32
      %9 = vector.broadcast %cst_8 : f32 to vector<64x128xf32>
      %c0_9 = arith.constant 0 : index
      %c0_10 = arith.constant 0 : index
      %10 = vector.load %arg5[%c0_9, %c0_10] : memref<64x128xf32, #tpu.memory_space<vmem>>, vector<64x128xf32>
      tpu.vector_store %arg5[%c0_9, %c0_10], %9 {strides = array<i32>} : memref<64x128xf32, #tpu.memory_space<vmem>>, vector<64x128xf32>,
    } else {
    }
    %c0 = arith.constant 0 : index
    %c0_1 = arith.constant 0 : index
    %3 = vector.load %arg3[%c0, %c0_1] : memref<64x128xf32, #tpu.memory_space<vmem>>, vector<64x128xf32>
    %c0_2 = arith.constant 0 : index
    %c0_3 = arith.constant 0 : index
    %4 = vector.load %arg5[%c0_2, %c0_3] : memref<64x128xf32, #tpu.memory_space<vmem>>, vector<64x128xf32>
    %c0_4 = arith.constant 0 : index
    %c0_5 = arith.constant 0 : index
    %5 = vector.load %arg4[%c0_4, %c0_5] : memref<128x128xf32, #tpu.memory_space<vmem>>, vector<128x128xf32>
    %cst = arith.constant dense<0.000000e+00> : vector<64x128xf32>
    %6 = tpu.matmul %3, %5, %cst {dimension_numbers = #tpu.dot_dimension_numbers<[1], [0], [0], [1], [0, 0, 1, 1], [], []>} : vector<64x128xf32>, vector<128x128xf32>, vector<64x128xf32> -> vector<64x128xf32>
    %7 = arith.addf %4, %6 : vector<64x128xf32>
    %c0_6 = arith.constant 0 : index
    %c0_7 = arith.constant 0 : index
    %8 = vector.load %arg5[%c0_6, %c0_7] : memref<64x128xf32, #tpu.memory_space<vmem>>, vector<64x128xf32>
    tpu.vector_store %arg5[%c0_6, %c0_7], %7 {strides = array<i32>} : memref<64x128xf32, #tpu.memory_space<vmem>>, vector<64x128xf32>,
    return
  }
  func.func @transform_0(%arg0: i32, %arg1: i32, %arg2: i32) -> (i32, i32) {
    %c0_i32 = arith.constant 0 : i32
    return %arg0, %arg2 : i32, i32
  }
  func.func @transform_1(%arg0: i32, %arg1: i32, %arg2: i32) -> (i32, i32) {
    %c0_i32 = arith.constant 0 : i32
    return %arg2, %arg1 : i32, i32
  }
  func.func @transform_2(%arg0: i32, %arg1: i32, %arg2: i32) -> (i32, i32) {
    %c0_i32 = arith.constant 0 : i32
    return %arg0, %arg1 : i32, i32
  }
}

</mosaic_0001>

<bundles_post_ra>
// kernel: gcn_layer_renorm.1
= control target key start
LH: loop header
LB: loop body
LE: loop exit
PB: predicated region body
PF: predicated region fallthrough
CT: control target
= control target key end

     0   :  { %s276_s1 = inlined_call_operand.vmem [shape: f32[128,128], index: 1, kind: input, shape index: {}]   ;;  %s277_s0 = inlined_call_operand.vmem [shape: f32[64,128], index: 0, kind: input, shape index: {}]   ;;  %s278_s2 = inlined_call_operand.vmem [shape: f32[64,128], index: 2, kind: output, shape index: {}]  }
   0x1   :  { %v54_v0 = vld [vmem:[%s276_s1 + $0x78] sm:$0xff]  ;;  %v53_v1 = vld [vmem:[%s276_s1 + $0x70] sm:$0xff]  ;;  %v52_v2 = vld [vmem:[%s276_s1 + $0x68] sm:$0xff] }
   0x2   :  { %117 = vmatpush.msra.mxu2 %v54_v0  ;;  %118 = vmatpush.msra.mxu3 %v54_v0  ;;  %v51_v3 = vld [vmem:[%s276_s1 + $0x60] sm:$0xff]  ;;  %v50_v4 = vld [vmem:[%s276_s1 + $0x58] sm:$0xff]  ;;  %v49_v5 = vld [vmem:[%s276_s1 + $0x50] sm:$0xff] }
   0x3   :  { %55 = vmatpush.msra.mxu0 %v54_v0  ;;  %116 = vmatpush.msra.mxu1 %v54_v0  ;;  %v48_v6 = vld [vmem:[%s276_s1 + $0x48] sm:$0xff]  ;;  %v47_v7 = vld [vmem:[%s276_s1 + $0x40] sm:$0xff]  ;;  %v46_v8 = vld [vmem:[%s276_s1 + $0x38] sm:$0xff] }
   0x4   :  { %120 = vmatpush.msra.mxu2 %v53_v1  ;;  %121 = vmatpush.msra.mxu3 %v53_v1  ;;  %v45_v9 = vld [vmem:[%s276_s1 + $0x30] sm:$0xff]  ;;  %v44_v10 = vld [vmem:[%s276_s1 + $0x28] sm:$0xff]  ;;  %v43_v11 = vld [vmem:[%s276_s1 + $0x20] sm:$0xff] }
   0x5   :  { %56 = vmatpush.msra.mxu0 %v53_v1  ;;  %119 = vmatpush.msra.mxu1 %v53_v1  ;;  %v42_v12 = vld [vmem:[%s276_s1 + $0x18] sm:$0xff]  ;;  %v41_v13 = vld [vmem:[%s276_s1 + $0x10] sm:$0xff]  ;;  %v40_v14 = vld [vmem:[%s276_s1 + $0x8] sm:$0xff] }
   0x6   :  { %123 = vmatpush.msra.mxu2 %v52_v2  ;;  %124 = vmatpush.msra.mxu3 %v52_v2  ;;  %v39_v15 = vld [vmem:[%s276_s1] sm:$0xff]  ;;  %v29_v17 = vld [vmem:[%s277_s0 + $0x30] sm:$0xff]  ;;  %v28_v20 = vld [vmem:[%s277_s0 + $0x28] sm:$0xff] }
   0x7   :  { %57 = vmatpush.msra.mxu0 %v52_v2  ;;  %122 = vmatpush.msra.mxu1 %v52_v2  ;;  %v27_v16 = vld [vmem:[%s277_s0 + $0x20] sm:$0xff]  ;;  %v25_v19 = vld [vmem:[%s277_s0 + $0x10] sm:$0xff]  ;;  %v30_v21 = vld [vmem:[%s277_s0 + $0x38] sm:$0xff] }
   0x8   :  { %126 = vmatpush.msra.mxu2 %v51_v3  ;;  %127 = vmatpush.msra.mxu3 %v51_v3  ;;  %v23_v18 = vld [vmem:[%s277_s0] sm:$0xff]  ;;  %v24_v22 = vld [vmem:[%s277_s0 + $0x8] sm:$0xff]  ;;  %v26_v23 = vld [vmem:[%s277_s0 + $0x18] sm:$0xff] }
   0x9   :  { %58 = vmatpush.msra.mxu0 %v51_v3  ;;  %125 = vmatpush.msra.mxu1 %v51_v3 }
   0xa   :  { %129 = vmatpush.msra.mxu2 %v50_v4  ;;  %130 = vmatpush.msra.mxu3 %v50_v4 }
   0xb   :  { %59 = vmatpush.msra.mxu0 %v50_v4  ;;  %128 = vmatpush.msra.mxu1 %v50_v4 }
   0xc   :  { %132 = vmatpush.msra.mxu2 %v49_v5  ;;  %133 = vmatpush.msra.mxu3 %v49_v5 }
   0xd   :  { %60 = vmatpush.msra.mxu0 %v49_v5  ;;  %131 = vmatpush.msra.mxu1 %v49_v5 }
   0xe   :  { %135 = vmatpush.msra.mxu2 %v48_v6  ;;  %136 = vmatpush.msra.mxu3 %v48_v6 }
   0xf   :  { %61 = vmatpush.msra.mxu0 %v48_v6  ;;  %134 = vmatpush.msra.mxu1 %v48_v6 }
  0x10   :  { %138 = vmatpush.msra.mxu2 %v47_v7  ;;  %139 = vmatpush.msra.mxu3 %v47_v7 }
  0x11   :  { %62 = vmatpush.msra.mxu0 %v47_v7  ;;  %137 = vmatpush.msra.mxu1 %v47_v7 }
  0x12   :  { %141 = vmatpush.msra.mxu2 %v46_v8  ;;  %142 = vmatpush.msra.mxu3 %v46_v8 }
  0x13   :  { %63 = vmatpush.msra.mxu0 %v46_v8  ;;  %140 = vmatpush.msra.mxu1 %v46_v8 }
  0x14   :  { %144 = vmatpush.msra.mxu2 %v45_v9  ;;  %145 = vmatpush.msra.mxu3 %v45_v9 }
  0x15   :  { %64 = vmatpush.msra.mxu0 %v45_v9  ;;  %143 = vmatpush.msra.mxu1 %v45_v9 }
  0x16   :  { %147 = vmatpush.msra.mxu2 %v44_v10  ;;  %148 = vmatpush.msra.mxu3 %v44_v10 }
  0x17   :  { %65 = vmatpush.msra.mxu0 %v44_v10  ;;  %146 = vmatpush.msra.mxu1 %v44_v10 }
  0x18   :  { %150 = vmatpush.msra.mxu2 %v43_v11  ;;  %151 = vmatpush.msra.mxu3 %v43_v11 }
  0x19   :  { %66 = vmatpush.msra.mxu0 %v43_v11  ;;  %149 = vmatpush.msra.mxu1 %v43_v11 }
  0x1a   :  { %153 = vmatpush.msra.mxu2 %v42_v12  ;;  %154 = vmatpush.msra.mxu3 %v42_v12 }
  0x1b   :  { %67 = vmatpush.msra.mxu0 %v42_v12  ;;  %152 = vmatpush.msra.mxu1 %v42_v12 }
  0x1c   :  { %156 = vmatpush.msra.mxu2 %v41_v13  ;;  %157 = vmatpush.msra.mxu3 %v41_v13 }
  0x1d   :  { %68 = vmatpush.msra.mxu0 %v41_v13  ;;  %155 = vmatpush.msra.mxu1 %v41_v13 }
  0x1e   :  { %159 = vmatpush.msra.mxu2 %v40_v14  ;;  %160 = vmatpush.msra.mxu3 %v40_v14 }
  0x1f   :  { %69 = vmatpush.msra.mxu0 %v40_v14  ;;  %158 = vmatpush.msra.mxu1 %v40_v14 }
  0x20   :  { %162 = vmatpush.msra.mxu2 %v39_v15  ;;  %163 = vmatpush.msra.mxu3 %v39_v15 }
  0x21   :  { %83 = vmatmul.f32.vlgmr.msra.gmra.mxu2 %v27_v16  ;;  %89 = vmatmul.f32.vlgmr.msra.gmra.mxu3 %v29_v17 }
  0x22   :  { %70 = vmatpush.msra.mxu0 %v39_v15  ;;  %161 = vmatpush.msra.mxu1 %v39_v15 }
  0x23   :  { %71 = vmatmul.f32.vlgmr.msra.gmra.mxu0 %v23_v18  ;;  %77 = vmatmul.f32.vlgmr.msra.gmra.mxu1 %v25_v19 }
  0x29   :  { %86 = vmatmul.f32.gmra.mxu2 %v28_v20  ;;  %92 = vmatmul.f32.gmra.mxu3 %v30_v21 }
  0x2b   :  { %74 = vmatmul.f32.gmra.mxu0 %v24_v22  ;;  %80 = vmatmul.f32.gmra.mxu1 %v26_v23 }
  0xa0   :  { %v72_v24 = vpop.f32.mrf.mxu0  ;;  %v78_v25 = vpop.f32.mrf.mxu1 }
  0xa1   :  { %104 = vst [vmem:[%s278_s2] sm:$0xff] %v72_v24 }
  0xa2   :  { %106 = vst [vmem:[%s278_s2 + $0x10] sm:$0xff] %v78_v25 }
  0xa4   :  { %v84_v26 = vpop.f32.mrf.mxu2  ;;  %v90_v27 = vpop.f32.mrf.mxu3 }
  0xa5   :  { %108 = vst [vmem:[%s278_s2 + $0x20] sm:$0xff] %v84_v26 }
  0xa6   :  { %110 = vst [vmem:[%s278_s2 + $0x30] sm:$0xff] %v90_v27 }
  0xa8   :  { %v75_v28 = vpop.f32.mrf.mxu0  ;;  %v81_v29 = vpop.f32.mrf.mxu1 }
  0xa9   :  { %105 = vst [vmem:[%s278_s2 + $0x8] sm:$0xff] %v75_v28 }
  0xaa   :  { %107 = vst [vmem:[%s278_s2 + $0x18] sm:$0xff] %v81_v29 }
  0xac   :  { %v87_v30 = vpop.f32.mrf.mxu2  ;;  %v93_v31 = vpop.f32.mrf.mxu3 }
  0xad   :  { %109 = vst [vmem:[%s278_s2 + $0x28] sm:$0xff] %v87_v30 }
  0xae   :  { %111 = vst [vmem:[%s278_s2 + $0x38] sm:$0xff] %v93_v31 }

</bundles_post_ra>
